<compile_context>
chip_gen: v5e
topology: v5e:2x2
jax: 0.10.0
libtpu: 0.0.40
codegen_flags: <defaults>
</compile_context>

<pallas_src>
import jax
import jax.numpy as jnp
from jax.experimental import pallas as pl
from jax.experimental.pallas import tpu as pltpu


def _round_up(a: int, b: int) -> int:
    return ((a + b - 1) // b) * b


# --------------------------------------------------------------------------
# Path A: table resident in VMEM (small / medium vocabularies)
# --------------------------------------------------------------------------
def _resident_gather_kernel(idx_ref, table_ref, out_ref):
    # idx_ref  : (n_pad,) int32 in SMEM (scalar prefetch)
    # table_ref: (V, 1, Dp) in VMEM -- whole table, resident across grid steps
    # out_ref  : (tb, Dp) output block in VMEM (lane-dense, Dp % 128 == 0)
    i = pl.program_id(0)
    tb = out_ref.shape[0]
    base = i * tb
    for j in range(tb):
        row = idx_ref[base + j]
        # Dynamic read on the leading (tile-aligned) dim of the VMEM table.
        out_ref[pl.ds(j, 1), :] = table_ref[row]


# --------------------------------------------------------------------------
# Path B: table stays in HBM, per-row DMA gather straight into the output
# --------------------------------------------------------------------------
def _hbm_gather_kernel(idx_ref, table_hbm, out_ref, sem):
    # idx_ref  : (n_pad,) int32 in SMEM (scalar prefetch)
    # table_hbm: (V, Dp) embedding table, raw HBM ref (memory_space=pl.ANY)
    # out_ref  : (tb, Dp) output block in VMEM -- row DMAs land here directly
    # sem      : (1,) DMA semaphore shared by all row copies of this step
    i = pl.program_id(0)
    tb = out_ref.shape[0]
    base = i * tb

    # Read every index before any `.wait()` (waits break SMEM sst->sld
    # forwarding), issue all TB row copies so they are in flight concurrently,
    # then wait on the *same* descriptors.  All copies are the same size, so a
    # single shared DMA semaphore is sufficient.
    rows = [idx_ref[base + j] for j in range(tb)]
    copies = []
    for j, row in enumerate(rows):
        cp = pltpu.make_async_copy(
            table_hbm.at[pl.ds(row, 1), :],
            out_ref.at[pl.ds(j, 1), :],
            sem.at[0],
        )
        cp.start()
        copies.append(cp)
    for cp in copies:
        cp.wait()


# --------------------------------------------------------------------------
# One pallas_call over a chunk of flat indices (len(flat_idx) % tb == 0)
# --------------------------------------------------------------------------
def _gather_chunk(flat_idx, table, *, resident, tb, vmem_limit=None):
    n_pad = flat_idx.shape[0]
    V, Dp = table.shape
    grid = (n_pad // tb,)
    compiler_params = pltpu.CompilerParams(
        dimension_semantics=("parallel",),   # independent row-groups (megacore)
        vmem_limit_bytes=vmem_limit,
    )

    if resident:
        # (V, 1, Dp): rows indexed on the leading dim (always tile-aligned).
        table3 = table.reshape(V, 1, Dp)
        grid_spec = pltpu.PrefetchScalarGridSpec(
            num_scalar_prefetch=1,                               # indices -> SMEM
            grid=grid,
            in_specs=[pl.BlockSpec((V, 1, Dp), lambda i, idx: (0, 0, 0))],
            out_specs=pl.BlockSpec((tb, Dp), lambda i, idx: (i, 0)),
        )
        return pl.pallas_call(
            _resident_gather_kernel,
            out_shape=jax.ShapeDtypeStruct((n_pad, Dp), table.dtype),
            grid_spec=grid_spec,
            compiler_params=compiler_params,
        )(flat_idx, table3)

    grid_spec = pltpu.PrefetchScalarGridSpec(
        num_scalar_prefetch=1,                                   # indices -> SMEM
        grid=grid,
        in_specs=[pl.BlockSpec(memory_space=pl.ANY)],            # table in HBM
        out_specs=pl.BlockSpec((tb, Dp), lambda i, idx: (i, 0)),
        scratch_shapes=[pltpu.SemaphoreType.DMA((1,))],          # one shared sem
    )
    return pl.pallas_call(
        _hbm_gather_kernel,
        out_shape=jax.ShapeDtypeStruct((n_pad, Dp), table.dtype),
        grid_spec=grid_spec,
        compiler_params=compiler_params,
    )(flat_idx, table)


# --------------------------------------------------------------------------
# Wrapper: equivalent of nn.Embedding(total_locations, embedding_dim)(x)
# --------------------------------------------------------------------------
def embedding_forward(x, table, *, tb_resident=128, tb_hbm=256,
                      max_idx_per_call=32768, force_path=None):
    V, D = table.shape
    out_dtype = table.dtype

    # Lane-dense output: pad the embedding dim to a multiple of 128 so the
    # per-step output store / DMA is unmasked; slice back afterwards.
    Dp = _round_up(D, 128)
    if Dp != D:
        table = jnp.pad(table, ((0, 0), (0, Dp - D)))

    flat = x.reshape(-1).astype(jnp.int32)
    n = flat.shape[0]
    # TODO(synk): torch.nn.Embedding raises on out-of-range indices; Pallas has
    # no clean in-kernel error path, so indices are clamped instead.
    flat = jnp.clip(flat, 0, V - 1)

    # Generation-aware resident-table budget (v7x: 64 MiB VMEM vs 128 MiB on
    # v5e/v6e).  The (V, 1, Dp) layout sublane-pads each row to 8 rows, so
    # budget 8x the raw bytes, x2 for pipelining buffers.
    try:
        vmem_cap = pltpu.get_tpu_info().vmem_capacity_bytes
    except Exception:  # be conservative if the query is unavailable
        vmem_cap = 64 * 1024 * 1024
    padded_table_bytes = V * 8 * Dp * table.dtype.itemsize
    auto_resident = 2 * padded_table_bytes <= vmem_cap // 4
    resident = auto_resident if force_path is None else (force_path == "resident")
    vmem_limit = min((vmem_cap * 3) // 4, 96 * 1024 * 1024) if resident else None

    # Rows gathered per grid step (sublane-aligned); larger TB on the HBM path
    # to amortize per-descriptor / per-step overhead.
    tb = min(tb_resident if resident else tb_hbm, _round_up(max(n, 1), 8))
    # Chunk long index streams so the scalar-prefetch array stays in SMEM.
    chunk = max(max_idx_per_call - (max_idx_per_call % tb), tb)

    outs = []
    for start in range(0, n, chunk):
        stop = min(start + chunk, n)
        idx = flat[start:stop]
        m = stop - start
        m_pad = _round_up(m, tb)
        if m_pad != m:
            idx = jnp.pad(idx, (0, m_pad - m))  # pad slots gather row 0, sliced off
        out = _gather_chunk(idx, table, resident=resident, tb=tb,
                            vmem_limit=vmem_limit)
        outs.append(out[:m])
    out = outs[0] if len(outs) == 1 else jnp.concatenate(outs, axis=0)

    if Dp != D:
        out = out[:, :D]
    return out.reshape(x.shape + (D,)).astype(out_dtype)


if __name__ == "__main__":
    total_locations = 64
    embedding_dim = 128

    key = jax.random.PRNGKey(0)
    k_tab, k_idx = jax.random.split(key)

    # Deterministic parameters (matches nn.Embedding weight shape (V, D)).
    table = jax.random.normal(
        k_tab, (total_locations, embedding_dim), dtype=jnp.float32
    )
    # Small integer index input: a batch of 2 sequences of length 8.
    x = jax.random.randint(
        k_idx, (2, 8), minval=0, maxval=total_locations, dtype=jnp.int32
    )

    ref = table[x]  # plain-JAX gather, same semantics as torch.nn.Embedding

    # Auto dispatch (this small table takes the VMEM-resident fast path).
    out = jax.block_until_ready(embedding_forward(x, table))
    assert out.shape == (2, 8, embedding_dim)
    assert out.dtype == jnp.float32
    assert jnp.allclose(out, ref, atol=1e-6), "resident-path mismatch vs reference"

    # Also exercise the HBM-DMA gather path (used for large vocabularies).
    out_hbm = jax.block_until_ready(embedding_forward(x, table, force_path="hbm"))
    assert jnp.allclose(out_hbm, ref, atol=1e-6), "hbm-path mismatch vs reference"

    print("KERNEL_OK")
</pallas_src>

<mosaic_0001>
module attributes {stable_mosaic.version = 11 : i64} {
  func.func @_resident_gather_kernel(%arg0: i32, %arg1: memref<16xi32, #tpu.memory_space<smem>>, %arg2: memref<64x1x128xf32, #tpu.memory_space<vmem>>, %arg3: memref<16x128xf32, #tpu.memory_space<vmem>>) attributes {dimension_semantics = [#tpu.dimension_semantics<parallel>], iteration_bounds = array<i64: 1>, scalar_prefetch = 1 : i64, scratch_operands = 0 : i64, tpu.core_type = #tpu.core_type<tc>, window_params = [{pipeline_mode = #tpu.pipeline_mode<synchronous>, transform_indices = @transform_0, window_bounds = array<i64: 64, 1, 128>}, {transform_indices = @transform_1, window_bounds = array<i64: 16, 128>}]} {
    %c16_i32 = arith.constant 16 : i32
    %0 = arith.muli %arg0, %c16_i32 : i32
    %c0_i32 = arith.constant 0 : i32
    %1 = arith.addi %0, %c0_i32 : i32
    %2 = arith.index_cast %1 : i32 to index
    %3 = memref.load %arg1[%2] : memref<16xi32, #tpu.memory_space<smem>>
    %4 = arith.index_cast %3 : i32 to index
    %c0 = arith.constant 0 : index
    %c0_0 = arith.constant 0 : index
    %5 = vector.load %arg2[%4, %c0, %c0_0] : memref<64x1x128xf32, #tpu.memory_space<vmem>>, vector<1x1x128xf32>
    %6 = vector.shape_cast %5 : vector<1x1x128xf32> to vector<1x128xf32>
    %c0_1 = arith.constant 0 : index
    %c0_2 = arith.constant 0 : index
    %7 = vector.load %arg3[%c0_1, %c0_2] : memref<16x128xf32, #tpu.memory_space<vmem>>, vector<1x128xf32>
    tpu.vector_store %arg3[%c0_1, %c0_2], %6 {strides = array<i32>} : memref<16x128xf32, #tpu.memory_space<vmem>>, vector<1x128xf32>,
    %c1_i32 = arith.constant 1 : i32
    %8 = arith.addi %0, %c1_i32 : i32
    %9 = arith.index_cast %8 : i32 to index
    %10 = memref.load %arg1[%9] : memref<16xi32, #tpu.memory_space<smem>>
    %11 = arith.index_cast %10 : i32 to index
    %c0_3 = arith.constant 0 : index
    %c0_4 = arith.constant 0 : index
    %12 = vector.load %arg2[%11, %c0_3, %c0_4] : memref<64x1x128xf32, #tpu.memory_space<vmem>>, vector<1x1x128xf32>
    %13 = vector.shape_cast %12 : vector<1x1x128xf32> to vector<1x128xf32>
    %c1 = arith.constant 1 : index
    %c0_5 = arith.constant 0 : index
    %14 = vector.load %arg3[%c1, %c0_5] : memref<16x128xf32, #tpu.memory_space<vmem>>, vector<1x128xf32>
    tpu.vector_store %arg3[%c1, %c0_5], %13 {strides = array<i32>} : memref<16x128xf32, #tpu.memory_space<vmem>>, vector<1x128xf32>,
    %c2_i32 = arith.constant 2 : i32
    %15 = arith.addi %0, %c2_i32 : i32
    %16 = arith.index_cast %15 : i32 to index
    %17 = memref.load %arg1[%16] : memref<16xi32, #tpu.memory_space<smem>>
    %18 = arith.index_cast %17 : i32 to index
    %c0_6 = arith.constant 0 : index
    %c0_7 = arith.constant 0 : index
    %19 = vector.load %arg2[%18, %c0_6, %c0_7] : memref<64x1x128xf32, #tpu.memory_space<vmem>>, vector<1x1x128xf32>
    %20 = vector.shape_cast %19 : vector<1x1x128xf32> to vector<1x128xf32>
    %c2 = arith.constant 2 : index
    %c0_8 = arith.constant 0 : index
    %21 = vector.load %arg3[%c2, %c0_8] : memref<16x128xf32, #tpu.memory_space<vmem>>, vector<1x128xf32>
    tpu.vector_store %arg3[%c2, %c0_8], %20 {strides = array<i32>} : memref<16x128xf32, #tpu.memory_space<vmem>>, vector<1x128xf32>,
    %c3_i32 = arith.constant 3 : i32
    %22 = arith.addi %0, %c3_i32 : i32
    %23 = arith.index_cast %22 : i32 to index
    %24 = memref.load %arg1[%23] : memref<16xi32, #tpu.memory_space<smem>>
    %25 = arith.index_cast %24 : i32 to index
    %c0_9 = arith.constant 0 : index
    %c0_10 = arith.constant 0 : index
    %26 = vector.load %arg2[%25, %c0_9, %c0_10] : memref<64x1x128xf32, #tpu.memory_space<vmem>>, vector<1x1x128xf32>
    %27 = vector.shape_cast %26 : vector<1x1x128xf32> to vector<1x128xf32>
    %c3 = arith.constant 3 : index
    %c0_11 = arith.constant 0 : index
    %28 = vector.load %arg3[%c3, %c0_11] : memref<16x128xf32, #tpu.memory_space<vmem>>, vector<1x128xf32>
    tpu.vector_store %arg3[%c3, %c0_11], %27 {strides = array<i32>} : memref<16x128xf32, #tpu.memory_space<vmem>>, vector<1x128xf32>,
    %c4_i32 = arith.constant 4 : i32
    %29 = arith.addi %0, %c4_i32 : i32
    %30 = arith.index_cast %29 : i32 to index
    %31 = memref.load %arg1[%30] : memref<16xi32, #tpu.memory_space<smem>>
    %32 = arith.index_cast %31 : i32 to index
    %c0_12 = arith.constant 0 : index
    %c0_13 = arith.constant 0 : index
    %33 = vector.load %arg2[%32, %c0_12, %c0_13] : memref<64x1x128xf32, #tpu.memory_space<vmem>>, vector<1x1x128xf32>
    %34 = vector.shape_cast %33 : vector<1x1x128xf32> to vector<1x128xf32>
    %c4 = arith.constant 4 : index
    %c0_14 = arith.constant 0 : index
    %35 = vector.load %arg3[%c4, %c0_14] : memref<16x128xf32, #tpu.memory_space<vmem>>, vector<1x128xf32>
    tpu.vector_store %arg3[%c4, %c0_14], %34 {strides = array<i32>} : memref<16x128xf32, #tpu.memory_space<vmem>>, vector<1x128xf32>,
    %c5_i32 = arith.constant 5 : i32
    %36 = arith.addi %0, %c5_i32 : i32
    %37 = arith.index_cast %36 : i32 to index
    %38 = memref.load %arg1[%37] : memref<16xi32, #tpu.memory_space<smem>>
    %39 = arith.index_cast %38 : i32 to index
    %c0_15 = arith.constant 0 : index
    %c0_16 = arith.constant 0 : index
    %40 = vector.load %arg2[%39, %c0_15, %c0_16] : memref<64x1x128xf32, #tpu.memory_space<vmem>>, vector<1x1x128xf32>
    %41 = vector.shape_cast %40 : vector<1x1x128xf32> to vector<1x128xf32>
    %c5 = arith.constant 5 : index
    %c0_17 = arith.constant 0 : index
    %42 = vector.load %arg3[%c5, %c0_17] : memref<16x128xf32, #tpu.memory_space<vmem>>, vector<1x128xf32>
    tpu.vector_store %arg3[%c5, %c0_17], %41 {strides = array<i32>} : memref<16x128xf32, #tpu.memory_space<vmem>>, vector<1x128xf32>,
    %c6_i32 = arith.constant 6 : i32
    %43 = arith.addi %0, %c6_i32 : i32
    %44 = arith.index_cast %43 : i32 to index
    %45 = memref.load %arg1[%44] : memref<16xi32, #tpu.memory_space<smem>>
    %46 = arith.index_cast %45 : i32 to index
    %c0_18 = arith.constant 0 : index
    %c0_19 = arith.constant 0 : index
    %47 = vector.load %arg2[%46, %c0_18, %c0_19] : memref<64x1x128xf32, #tpu.memory_space<vmem>>, vector<1x1x128xf32>
    %48 = vector.shape_cast %47 : vector<1x1x128xf32> to vector<1x128xf32>
    %c6 = arith.constant 6 : index
    %c0_20 = arith.constant 0 : index
    %49 = vector.load %arg3[%c6, %c0_20] : memref<16x128xf32, #tpu.memory_space<vmem>>, vector<1x128xf32>
    tpu.vector_store %arg3[%c6, %c0_20], %48 {strides = array<i32>} : memref<16x128xf32, #tpu.memory_space<vmem>>, vector<1x128xf32>,
    %c7_i32 = arith.constant 7 : i32
    %50 = arith.addi %0, %c7_i32 : i32
    %51 = arith.index_cast %50 : i32 to index
    %52 = memref.load %arg1[%51] : memref<16xi32, #tpu.memory_space<smem>>
    %53 = arith.index_cast %52 : i32 to index
    %c0_21 = arith.constant 0 : index
    %c0_22 = arith.constant 0 : index
    %54 = vector.load %arg2[%53, %c0_21, %c0_22] : memref<64x1x128xf32, #tpu.memory_space<vmem>>, vector<1x1x128xf32>
    %55 = vector.shape_cast %54 : vector<1x1x128xf32> to vector<1x128xf32>
    %c7 = arith.constant 7 : index
    %c0_23 = arith.constant 0 : index
    %56 = vector.load %arg3[%c7, %c0_23] : memref<16x128xf32, #tpu.memory_space<vmem>>, vector<1x128xf32>
    tpu.vector_store %arg3[%c7, %c0_23], %55 {strides = array<i32>} : memref<16x128xf32, #tpu.memory_space<vmem>>, vector<1x128xf32>,
    %c8_i32 = arith.constant 8 : i32
    %57 = arith.addi %0, %c8_i32 : i32
    %58 = arith.index_cast %57 : i32 to index
    %59 = memref.load %arg1[%58] : memref<16xi32, #tpu.memory_space<smem>>
    %60 = arith.index_cast %59 : i32 to index
    %c0_24 = arith.constant 0 : index
    %c0_25 = arith.constant 0 : index
    %61 = vector.load %arg2[%60, %c0_24, %c0_25] : memref<64x1x128xf32, #tpu.memory_space<vmem>>, vector<1x1x128xf32>
    %62 = vector.shape_cast %61 : vector<1x1x128xf32> to vector<1x128xf32>
    %c8 = arith.constant 8 : index
    %c0_26 = arith.constant 0 : index
    %63 = vector.load %arg3[%c8, %c0_26] : memref<16x128xf32, #tpu.memory_space<vmem>>, vector<1x128xf32>
    tpu.vector_store %arg3[%c8, %c0_26], %62 {strides = array<i32>} : memref<16x128xf32, #tpu.memory_space<vmem>>, vector<1x128xf32>,
    %c9_i32 = arith.constant 9 : i32
    %64 = arith.addi %0, %c9_i32 : i32
    %65 = arith.index_cast %64 : i32 to index
    %66 = memref.load %arg1[%65] : memref<16xi32, #tpu.memory_space<smem>>
    %67 = arith.index_cast %66 : i32 to index
    %c0_27 = arith.constant 0 : index
    %c0_28 = arith.constant 0 : index
    %68 = vector.load %arg2[%67, %c0_27, %c0_28] : memref<64x1x128xf32, #tpu.memory_space<vmem>>, vector<1x1x128xf32>
    %69 = vector.shape_cast %68 : vector<1x1x128xf32> to vector<1x128xf32>
    %c9 = arith.constant 9 : index
    %c0_29 = arith.constant 0 : index
    %70 = vector.load %arg3[%c9, %c0_29] : memref<16x128xf32, #tpu.memory_space<vmem>>, vector<1x128xf32>
    tpu.vector_store %arg3[%c9, %c0_29], %69 {strides = array<i32>} : memref<16x128xf32, #tpu.memory_space<vmem>>, vector<1x128xf32>,
    %c10_i32 = arith.constant 10 : i32
    %71 = arith.addi %0, %c10_i32 : i32
    %72 = arith.index_cast %71 : i32 to index
    %73 = memref.load %arg1[%72] : memref<16xi32, #tpu.memory_space<smem>>
    %74 = arith.index_cast %73 : i32 to index
    %c0_30 = arith.constant 0 : index
    %c0_31 = arith.constant 0 : index
    %75 = vector.load %arg2[%74, %c0_30, %c0_31] : memref<64x1x128xf32, #tpu.memory_space<vmem>>, vector<1x1x128xf32>
    %76 = vector.shape_cast %75 : vector<1x1x128xf32> to vector<1x128xf32>
    %c10 = arith.constant 10 : index
    %c0_32 = arith.constant 0 : index
    %77 = vector.load %arg3[%c10, %c0_32] : memref<16x128xf32, #tpu.memory_space<vmem>>, vector<1x128xf32>
    tpu.vector_store %arg3[%c10, %c0_32], %76 {strides = array<i32>} : memref<16x128xf32, #tpu.memory_space<vmem>>, vector<1x128xf32>,
    %c11_i32 = arith.constant 11 : i32
    %78 = arith.addi %0, %c11_i32 : i32
    %79 = arith.index_cast %78 : i32 to index
    %80 = memref.load %arg1[%79] : memref<16xi32, #tpu.memory_space<smem>>
    %81 = arith.index_cast %80 : i32 to index
    %c0_33 = arith.constant 0 : index
    %c0_34 = arith.constant 0 : index
    %82 = vector.load %arg2[%81, %c0_33, %c0_34] : memref<64x1x128xf32, #tpu.memory_space<vmem>>, vector<1x1x128xf32>
    %83 = vector.shape_cast %82 : vector<1x1x128xf32> to vector<1x128xf32>
    %c11 = arith.constant 11 : index
    %c0_35 = arith.constant 0 : index
    %84 = vector.load %arg3[%c11, %c0_35] : memref<16x128xf32, #tpu.memory_space<vmem>>, vector<1x128xf32>
    tpu.vector_store %arg3[%c11, %c0_35], %83 {strides = array<i32>} : memref<16x128xf32, #tpu.memory_space<vmem>>, vector<1x128xf32>,
    %c12_i32 = arith.constant 12 : i32
    %85 = arith.addi %0, %c12_i32 : i32
    %86 = arith.index_cast %85 : i32 to index
    %87 = memref.load %arg1[%86] : memref<16xi32, #tpu.memory_space<smem>>
    %88 = arith.index_cast %87 : i32 to index
    %c0_36 = arith.constant 0 : index
    %c0_37 = arith.constant 0 : index
    %89 = vector.load %arg2[%88, %c0_36, %c0_37] : memref<64x1x128xf32, #tpu.memory_space<vmem>>, vector<1x1x128xf32>
    %90 = vector.shape_cast %89 : vector<1x1x128xf32> to vector<1x128xf32>
    %c12 = arith.constant 12 : index
    %c0_38 = arith.constant 0 : index
    %91 = vector.load %arg3[%c12, %c0_38] : memref<16x128xf32, #tpu.memory_space<vmem>>, vector<1x128xf32>
    tpu.vector_store %arg3[%c12, %c0_38], %90 {strides = array<i32>} : memref<16x128xf32, #tpu.memory_space<vmem>>, vector<1x128xf32>,
    %c13_i32 = arith.constant 13 : i32
    %92 = arith.addi %0, %c13_i32 : i32
    %93 = arith.index_cast %92 : i32 to index
    %94 = memref.load %arg1[%93] : memref<16xi32, #tpu.memory_space<smem>>
    %95 = arith.index_cast %94 : i32 to index
    %c0_39 = arith.constant 0 : index
    %c0_40 = arith.constant 0 : index
    %96 = vector.load %arg2[%95, %c0_39, %c0_40] : memref<64x1x128xf32, #tpu.memory_space<vmem>>, vector<1x1x128xf32>
    %97 = vector.shape_cast %96 : vector<1x1x128xf32> to vector<1x128xf32>
    %c13 = arith.constant 13 : index
    %c0_41 = arith.constant 0 : index
    %98 = vector.load %arg3[%c13, %c0_41] : memref<16x128xf32, #tpu.memory_space<vmem>>, vector<1x128xf32>
    tpu.vector_store %arg3[%c13, %c0_41], %97 {strides = array<i32>} : memref<16x128xf32, #tpu.memory_space<vmem>>, vector<1x128xf32>,
    %c14_i32 = arith.constant 14 : i32
    %99 = arith.addi %0, %c14_i32 : i32
    %100 = arith.index_cast %99 : i32 to index
    %101 = memref.load %arg1[%100] : memref<16xi32, #tpu.memory_space<smem>>
    %102 = arith.index_cast %101 : i32 to index
    %c0_42 = arith.constant 0 : index
    %c0_43 = arith.constant 0 : index
    %103 = vector.load %arg2[%102, %c0_42, %c0_43] : memref<64x1x128xf32, #tpu.memory_space<vmem>>, vector<1x1x128xf32>
    %104 = vector.shape_cast %103 : vector<1x1x128xf32> to vector<1x128xf32>
    %c14 = arith.constant 14 : index
    %c0_44 = arith.constant 0 : index
    %105 = vector.load %arg3[%c14, %c0_44] : memref<16x128xf32, #tpu.memory_space<vmem>>, vector<1x128xf32>
    tpu.vector_store %arg3[%c14, %c0_44], %104 {strides = array<i32>} : memref<16x128xf32, #tpu.memory_space<vmem>>, vector<1x128xf32>,
    %c15_i32 = arith.constant 15 : i32
    %106 = arith.addi %0, %c15_i32 : i32
    %107 = arith.index_cast %106 : i32 to index
    %108 = memref.load %arg1[%107] : memref<16xi32, #tpu.memory_space<smem>>
    %109 = arith.index_cast %108 : i32 to index
    %c0_45 = arith.constant 0 : index
    %c0_46 = arith.constant 0 : index
    %110 = vector.load %arg2[%109, %c0_45, %c0_46] : memref<64x1x128xf32, #tpu.memory_space<vmem>>, vector<1x1x128xf32>
    %111 = vector.shape_cast %110 : vector<1x1x128xf32> to vector<1x128xf32>
    %c15 = arith.constant 15 : index
    %c0_47 = arith.constant 0 : index
    %112 = vector.load %arg3[%c15, %c0_47] : memref<16x128xf32, #tpu.memory_space<vmem>>, vector<1x128xf32>
    tpu.vector_store %arg3[%c15, %c0_47], %111 {strides = array<i32>} : memref<16x128xf32, #tpu.memory_space<vmem>>, vector<1x128xf32>,
    return
  }
  func.func @transform_0(%arg0: i32, %arg1: memref<16xi32, #tpu.memory_space<smem>>) -> (i32, i32, i32) {
    %c0_i32 = arith.constant 0 : i32
    %c0_i32_0 = arith.constant 0 : i32
    %c0_i32_1 = arith.constant 0 : i32
    %c0_i32_2 = arith.constant 0 : i32
    return %c0_i32, %c0_i32_0, %c0_i32_1 : i32, i32, i32
  }
  func.func @transform_1(%arg0: i32, %arg1: memref<16xi32, #tpu.memory_space<smem>>) -> (i32, i32) {
    %c0_i32 = arith.constant 0 : i32
    %c0_i32_0 = arith.constant 0 : i32
    return %arg0, %c0_i32 : i32, i32
  }
}

</mosaic_0001>

<bundles_post_ra>
// kernel: tpu_custom_call.1
= control target key start
LH: loop header
LB: loop body
LE: loop exit
PB: predicated region body
PF: predicated region fallthrough
CT: control target
= control target key end

     0   :  { %s237_s12 = smov [#allocation3]   ;;  %s271_s0 = inlined_call_operand.hbm [shape: s32[16], index: 0, kind: input, shape index: {}]   ;;  %s272_s1 = inlined_call_operand.hbm [shape: f32[64,1,128], index: 1, kind: input, shape index: {}]   ;;  %s273_s2 = inlined_call_operand.hbm [shape: f32[16,128], index: 2, kind: output, shape index: {}]  }
   0x1   :  { %s8_s11 = sshll.u32 %s271_s0, 4  ;;  %s9_s11 = int_to_ptr.hbm [resolvable:$true] %s8_s11 }
   0x2   :  { %11 = dma.hbm_to_smem %s9_s11, 16, %s237_s12, [#allocation2] }
   0x3   :  { %231 = dma.done.wait [#allocation2], 16 }
   0x4   :  { %232 = vsyncadd [#allocation2], 4294967280 }
   0x5   :  { %14 = sfence }
   0x6   :  { %15 = vsyncpa [#allocation5], 0 }
   0x7   :  { %16 = vsyncpa [#allocation6], 0  ;;  %s21_s15 = sshll.u32 %s272_s1, 4  ;;  %s238_s16 = smov [#allocation4]   ;;  %s22_s15 = int_to_ptr.hbm [resolvable:$true] %s21_s15 }
   0x8   :  { %s23_s17 = sshll.u32 %s238_s16, 4  ;;  %s239_s18 = smov 16   ;;  %s24_s17 = int_to_ptr.vmem [resolvable:$true] %s23_s17 }
   0x9   :  { %s240_s19 = smov 1  }
   0xa   :  { %29 = dma.hbm_to_vmem [thread:$0]  %s22_s15, 1024, %s24_s17, [#allocation5], %s239_s18, %s239_s18, %s240_s19  }
   0xb   :  { %233 = dma.done.wait [#allocation5], 1024  }
   0xc   :  { %234 = vsyncadd [#allocation5], 4294966272  ;;  %s35_s0 = sld [smem:[#allocation3]]  ;;  %s241_s12 = smov [#allocation7]  }
   0xd   :  { %s149_s20 = sld [smem:[#allocation3 + $0x1]]  ;;  %s265_s13 = sshll.u32 %s241_s12, 4  ;;  %s119_s13 = int_to_ptr.vmem [resolvable:$true] %s265_s13 }
   0xe   :  { %s150_s21 = sld [smem:[#allocation3 + $0x2]] }
   0xf   :  { %s151_s22 = sld [smem:[#allocation3 + $0x3]] }
  0x10   :  { %s152_s23 = sld [smem:[#allocation3 + $0x4]] }
  0x11   :  { %s153_s24 = sld [smem:[#allocation3 + $0x5]] }
  0x12   :  { %s154_s25 = sld [smem:[#allocation3 + $0x6]]  ;;  %s36_s26 = scalar_lea.vmem [#allocation4], %s35_s0 }
  0x13   :  { %v37_v0 = vld [vmem:[%s36_s26] sm:$0x1]  ;;  %s155_s27 = sld [smem:[#allocation3 + $0x7]]  ;;  %s41_s1 = scalar_lea.vmem [#allocation4], %s149_s20 }
  0x14   :  { %38 = vst [vmem:[#allocation7] sm:$0x1] %v37_v0  ;;  %v42_v1 = vld [vmem:[%s41_s1] sm:$0x1]  ;;  %s46_s28 = scalar_lea.vmem [#allocation4], %s150_s21  ;;  %s156_s6 = sld [smem:[#allocation3 + $0x8]] }
  0x15   :  { %43 = vst [vmem:[#allocation7 + $0x1] sm:$0x1] %v42_v1  ;;  %v47_v2 = vld [vmem:[%s46_s28] sm:$0x1]  ;;  %s51_s29 = scalar_lea.vmem [#allocation4], %s151_s22  ;;  %s157_s7 = sld [smem:[#allocation3 + $0x9]] }
  0x16   :  { %48 = vst [vmem:[#allocation7 + $0x2] sm:$0x1] %v47_v2  ;;  %v52_v3 = vld [vmem:[%s51_s29] sm:$0x1]  ;;  %s56_s30 = scalar_lea.vmem [#allocation4], %s152_s23  ;;  %s158_s8 = sld [smem:[#allocation3 + $0xa]] }
  0x17   :  { %53 = vst [vmem:[#allocation7 + $0x3] sm:$0x1] %v52_v3  ;;  %v57_v4 = vld [vmem:[%s56_s30] sm:$0x1]  ;;  %s61_s3 = scalar_lea.vmem [#allocation4], %s153_s24  ;;  %s159_s9 = sld [smem:[#allocation3 + $0xb]] }
  0x18   :  { %58 = vst [vmem:[#allocation7 + $0x4] sm:$0x1] %v57_v4  ;;  %v62_v5 = vld [vmem:[%s61_s3] sm:$0x1]  ;;  %s66_s4 = scalar_lea.vmem [#allocation4], %s154_s25  ;;  %s160_s10 = sld [smem:[#allocation3 + $0xc]] }
  0x19   :  { %63 = vst [vmem:[#allocation7 + $0x5] sm:$0x1] %v62_v5  ;;  %v67_v6 = vld [vmem:[%s66_s4] sm:$0x1]  ;;  %s71_s5 = scalar_lea.vmem [#allocation4], %s155_s27  ;;  %s161_s11 = sld [smem:[#allocation3 + $0xd]] }
  0x1a   :  { %68 = vst [vmem:[#allocation7 + $0x6] sm:$0x1] %v67_v6  ;;  %v72_v7 = vld [vmem:[%s71_s5] sm:$0x1]  ;;  %s162_s14 = sld [smem:[#allocation3 + $0xe]]  ;;  %s76_s15 = scalar_lea.vmem [#allocation4], %s156_s6 }
  0x1b   :  { %73 = vst [vmem:[#allocation7 + $0x7] sm:$0x1] %v72_v7  ;;  %v77_v8 = vld [vmem:[%s76_s15] sm:$0x1]  ;;  %s163_s16 = sld [smem:[#allocation3 + $0xf]]  ;;  %s81_s17 = scalar_lea.vmem [#allocation4], %s157_s7 }
  0x1c   :  { %78 = vst [vmem:[#allocation7 + $0x8] sm:$0x1] %v77_v8  ;;  %v82_v9 = vld [vmem:[%s81_s17] sm:$0x1]  ;;  %s120_s0 = sshll.u32 %s273_s2, 4  ;;  %s86_s20 = scalar_lea.vmem [#allocation4], %s158_s8  ;;  %s121_s0 = int_to_ptr.hbm [resolvable:$true] %s120_s0 }
  0x1d   :  { %83 = vst [vmem:[#allocation7 + $0x9] sm:$0x1] %v82_v9  ;;  %v87_v10 = vld [vmem:[%s86_s20] sm:$0x1]  ;;  %s91_s21 = scalar_lea.vmem [#allocation4], %s159_s9  ;;  %s242_s2 = smov 128  }
  0x1e   :  { %88 = vst [vmem:[#allocation7 + $0xa] sm:$0x1] %v87_v10  ;;  %v92_v11 = vld [vmem:[%s91_s21] sm:$0x1]  ;;  %s96_s22 = scalar_lea.vmem [#allocation4], %s160_s10  ;;  %s243_s26 = smov 8  }
  0x1f   :  { %93 = vst [vmem:[#allocation7 + $0xb] sm:$0x1] %v92_v11  ;;  %v97_v12 = vld [vmem:[%s96_s22] sm:$0x1]  ;;  %s101_s23 = scalar_lea.vmem [#allocation4], %s161_s11 }
  0x20   :  { %98 = vst [vmem:[#allocation7 + $0xc] sm:$0x1] %v97_v12  ;;  %v102_v13 = vld [vmem:[%s101_s23] sm:$0x1]  ;;  %s106_s24 = scalar_lea.vmem [#allocation4], %s162_s14 }
  0x21   :  { %103 = vst [vmem:[#allocation7 + $0xd] sm:$0x1] %v102_v13  ;;  %v107_v14 = vld [vmem:[%s106_s24] sm:$0x1]  ;;  %s111_s25 = scalar_lea.vmem [#allocation4], %s163_s16 }
  0x22   :  { %108 = vst [vmem:[#allocation7 + $0xe] sm:$0x1] %v107_v14  ;;  %v112_v15 = vld [vmem:[%s111_s25] sm:$0x1] }
  0x23   :  { %113 = vst [vmem:[#allocation7 + $0xf] sm:$0x1] %v112_v15 }
  0x24   :  { %126 = dma.vmem_to_hbm [thread:$0]  %s119_s13, 256, %s121_s0, [#allocation6], %s242_s2, %s242_s2, %s243_s26  }
  0x25   :  { %235 = dma.done.wait [#allocation6], 256  }
  0x26   :  { %236 = vsyncadd [#allocation6], 4294967040 }
  0x27   :  { %131 = vsyncpa [#allocation5], 1 }
  0x28   :  { %132 = vsyncpa [#allocation6], 1 }

</bundles_post_ra>
